<compile_context>
chip_gen: v7x
topology: tpu7x:2x2x1
jax: 0.10.0
libtpu: 0.0.40
codegen_flags: <defaults>
</compile_context>

<pallas_src>
import functools
import math

import jax
import jax.numpy as jnp
from jax.experimental import pallas as pl
from jax.experimental.pallas import tpu as pltpu


@functools.lru_cache(maxsize=None)
def _vmem_limit_bytes():
    """Per-generation scoped-VMEM ceiling, leaving headroom for Mosaic scratch."""
    try:
        cap = int(pltpu.get_tpu_info().vmem_capacity_bytes)
    except Exception:
        cap = 64 * 1024 * 1024  # conservative fallback (v7x physical size)
    return max(32 * 1024 * 1024, min((cap * 3) // 4, 110 * 1024 * 1024))


def _kv_proj_kernel(x_ref, w_ref, o_ref):
    """(block_rows, d_in) @ (d_in, d_pad) -> one K or V column block."""
    o_ref[...] = jnp.dot(
        x_ref[...], w_ref[...], preferred_element_type=jnp.float32
    ).astype(o_ref.dtype)


def _flash_attn_kernel(x_ref, wq_ref, k_ref, v_ref, *rest, has_bias):
    """Flash-style online-softmax attention with the Q projection fused in.

    Grid = (q_tiles, kv_tiles). q/m/l/acc live in VMEM scratch across the kv
    axis. The 1/sqrt(d_out) scale is pre-folded into wq. Padded keys are masked
    via an additive bias row, only passed when padding exists.
    """
    if has_bias:
        bias_ref, o_ref, q_scr, m_scr, l_scr, acc_scr = rest
    else:
        o_ref, q_scr, m_scr, l_scr, acc_scr = rest
        bias_ref = None

    ki = pl.program_id(1)

    @pl.when(ki == 0)
    def _init():
        # Fused Q projection: computed once per q tile, resident across kv steps.
        q_scr[...] = jnp.dot(
            x_ref[...], wq_ref[...], preferred_element_type=jnp.float32
        ).astype(q_scr.dtype)
        m_scr[...] = jnp.full_like(m_scr, -jnp.inf)
        l_scr[...] = jnp.zeros_like(l_scr)
        acc_scr[...] = jnp.zeros_like(acc_scr)

    # Q @ K^T: contract the last dims directly (no XLU transpose of K).
    s = jax.lax.dot_general(
        q_scr[...], k_ref[...], (((1,), (1,)), ((), ())),
        preferred_element_type=jnp.float32)

    if has_bias:
        # Additive -1e30 on padded key columns (cheaper than per-step
        # iota+compare+select; statically skipped when seq needs no padding).
        s = s + bias_ref[...]

    m_prev = m_scr[...]
    m_new = jnp.maximum(m_prev, jnp.max(s, axis=-1, keepdims=True))
    alpha = jnp.exp(m_prev - m_new)
    p = jnp.exp(s - m_new)

    l_scr[...] = alpha * l_scr[...] + jnp.sum(p, axis=-1, keepdims=True)
    acc_scr[...] = alpha * acc_scr[...] + jnp.dot(
        p.astype(v_ref.dtype), v_ref[...], preferred_element_type=jnp.float32)
    m_scr[...] = m_new

    @pl.when(ki == pl.num_programs(1) - 1)
    def _finalize():
        l = l_scr[...]
        inv = pl.reciprocal(l, approx=True)   # EUP vrcp (its own VLIW slot)
        inv = inv * (2.0 - l * inv)           # one Newton step -> ~f32 accuracy
        o_ref[...] = (acc_scr[...] * inv).astype(o_ref.dtype)


def self_attention_v2(x, w_query, w_key, w_value, *, block_q=256, block_k=512,
                      compute_dtype=jnp.bfloat16):
    """Forward pass of SelfAttention_v2.

    x: (seq, d_in); w_*: PyTorch nn.Linear weights of shape (d_out, d_in), no
    bias. Returns (seq, d_out) in x.dtype. `compute_dtype` is the on-chip
    storage dtype for Q/K/V (bf16 by default; all dots accumulate in f32).
    """
    seq, d_in = x.shape
    d_out = w_query.shape[0]
    out_dtype = x.dtype
    scale = 1.0 / float(d_out) ** 0.5
    cdt = jnp.dtype(compute_dtype)
    itemsize = cdt.itemsize

    # Lane-dense padded head dim; clamp tiles for short sequences, then pad the
    # sequence so both tile sizes divide it.
    d_pad = pl.cdiv(d_out, 128) * 128
    seq_r = pl.cdiv(seq, 128) * 128
    block_q = min(block_q, seq_r)
    block_k = min(block_k, seq_r)
    tile_lcm = math.lcm(block_q, block_k)
    seq_pad = pl.cdiv(seq, tile_lcm) * tile_lcm

    # One-time O(d_in*d_out) weight prep: transpose to (d_in, d_out), fold the
    # 1/sqrt(d_out) softmax scale into W_q, zero-pad to a lane-dense d_pad.
    def _pad_w(w, s=1.0):
        wt = (w.T * s).astype(cdt)
        return jnp.pad(wt, ((0, 0), (0, d_pad - d_out)))

    w_q = _pad_w(w_query, scale)
    w_kv = jnp.concatenate([_pad_w(w_key), _pad_w(w_value)], axis=1)
    x_p = jnp.pad(x.astype(cdt), ((0, seq_pad - seq), (0, 0)))

    vmem_limit = _vmem_limit_bytes()

    # --- Stage 1: fused K/V projection (Q is fused into the attention kernel).
    # NOTE: for very large d_in, additionally tile the contraction axis here.
    block_rows = next(b for b in (512, 384, 256, 128, 64, 32, 16, 8)
                      if seq_pad % b == 0)
    n_rows = seq_pad // block_rows
    kv = pl.pallas_call(
        _kv_proj_kernel,
        out_shape=jax.ShapeDtypeStruct((seq_pad, 2 * d_pad), cdt),
        grid_spec=pltpu.PrefetchScalarGridSpec(
            num_scalar_prefetch=0,
            grid=(2, n_rows),   # weight column (K/V) outer -> weight stays resident
            in_specs=[pl.BlockSpec((block_rows, d_in), lambda j, i: (i, 0)),
                      pl.BlockSpec((d_in, d_pad), lambda j, i: (0, j))],
            out_specs=pl.BlockSpec((block_rows, d_pad), lambda j, i: (i, j))),
        compiler_params=pltpu.CompilerParams(
            dimension_semantics=("parallel", "parallel"),
            vmem_limit_bytes=vmem_limit),
        cost_estimate=pl.CostEstimate(
            flops=2 * seq_pad * d_in * 2 * d_pad,
            transcendentals=0,
            bytes_accessed=(2 * seq_pad * d_in + 2 * d_in * d_pad
                            + 2 * seq_pad * d_pad) * itemsize),
    )(x_p, w_kv)

    # --- Stage 2: flash attention with fused Q projection ---------------------
    nq = seq_pad // block_q
    nk = seq_pad // block_k
    # Padded keys exist whenever the sequence was padded at all (NOT only when
    # seq % block_k != 0 — that was wrong for block_q != block_k).
    need_kv_mask = seq_pad != seq

    in_specs = [
        pl.BlockSpec((block_q, d_in), lambda qi, ki: (qi, 0)),   # x rows -> Q
        pl.BlockSpec((d_in, d_pad), lambda qi, ki: (0, 0)),      # W_q (resident)
        pl.BlockSpec((block_k, d_pad), lambda qi, ki: (ki, 0)),  # K tile
        pl.BlockSpec((block_k, d_pad), lambda qi, ki: (ki, 1)),  # V tile
    ]
    inputs = [x_p, w_q, kv, kv]
    if need_kv_mask:
        key_bias = jnp.where(jnp.arange(seq_pad) < seq, 0.0, -1e30)
        inputs.append(key_bias.astype(jnp.float32).reshape(1, seq_pad))
        in_specs.append(pl.BlockSpec((1, block_k), lambda qi, ki: (0, ki)))

    kernel = functools.partial(_flash_attn_kernel, has_bias=need_kv_mask)

    out_p = pl.pallas_call(
        kernel,
        out_shape=jax.ShapeDtypeStruct((seq_pad, d_pad), out_dtype),
        grid_spec=pltpu.PrefetchScalarGridSpec(
            num_scalar_prefetch=0,
            grid=(nq, nk),
            in_specs=in_specs,
            out_specs=pl.BlockSpec((block_q, d_pad), lambda qi, ki: (qi, 0)),
            scratch_shapes=[pltpu.VMEM((block_q, d_pad), cdt),           # Q
                            pltpu.VMEM((block_q, 1), jnp.float32),       # m
                            pltpu.VMEM((block_q, 1), jnp.float32),       # l
                            pltpu.VMEM((block_q, d_pad), jnp.float32)]), # acc
        compiler_params=pltpu.CompilerParams(
            # NOTE: on v7x (2 TensorCores/chip) switch the first axis to
            # pltpu.CORE_PARALLEL to split q tiles across cores.
            dimension_semantics=("parallel", "arbitrary"),
            vmem_limit_bytes=vmem_limit),
        cost_estimate=pl.CostEstimate(
            flops=2 * seq_pad * d_in * d_pad + 4 * seq_pad * seq_pad * d_pad,
            transcendentals=seq_pad * seq_pad,
            bytes_accessed=(seq_pad * d_in + d_in * d_pad + seq_pad * d_pad
                            + 2 * nq * seq_pad * d_pad) * itemsize),
    )(*inputs)

    # Strip the sequence / lane padding.
    return out_p[:seq, :d_out]


def _reference(x, wq, wk, wv):
    hp = jax.lax.Precision.HIGHEST
    q = jnp.dot(x, wq.T, precision=hp)
    k = jnp.dot(x, wk.T, precision=hp)
    v = jnp.dot(x, wv.T, precision=hp)
    scores = jnp.dot(q, k.T, precision=hp) / (k.shape[-1] ** 0.5)
    w = jax.nn.softmax(scores, axis=-1)
    return jnp.dot(w, v, precision=hp)


if __name__ == "__main__":
    seq, d_in, d_out = 8, 32, 16

    key = jax.random.PRNGKey(0)
    kx, kq, kk, kv = jax.random.split(key, 4)

    x = jax.random.normal(kx, (seq, d_in), dtype=jnp.float32)
    # nn.Linear-style init: uniform(-1/sqrt(d_in), 1/sqrt(d_in)), shape
    # (d_out, d_in), bias disabled (qkv_bias=False).
    bound = 1.0 / (d_in ** 0.5)
    w_query = jax.random.uniform(kq, (d_out, d_in), jnp.float32, -bound, bound)
    w_key = jax.random.uniform(kk, (d_out, d_in), jnp.float32, -bound, bound)
    w_value = jax.random.uniform(kv, (d_out, d_in), jnp.float32, -bound, bound)

    ref = _reference(x, w_query, w_key, w_value)

    # Default (bf16 on-chip storage) path — loose tolerance for the bf16 cast.
    out = jax.block_until_ready(self_attention_v2(x, w_query, w_key, w_value))
    assert out.shape == (seq, d_out)
    assert jnp.allclose(out, ref, atol=1e-1, rtol=1e-1), "bf16 path mismatch"

    # f32 path — tight check that the flash/online-softmax algorithm is exact.
    out_f32 = jax.block_until_ready(
        self_attention_v2(x, w_query, w_key, w_value,
                          compute_dtype=jnp.float32))
    assert jnp.allclose(out_f32, ref, atol=1e-3, rtol=1e-3), "f32 path mismatch"

    # Multi-tile case with a padded tail (exercises online softmax across kv
    # tiles and the padded-key bias on the last tile).
    seq2 = 136
    x2 = jax.random.normal(kx, (seq2, d_in), dtype=jnp.float32)
    ref2 = _reference(x2, w_query, w_key, w_value)
    out2 = jax.block_until_ready(
        self_attention_v2(x2, w_query, w_key, w_value,
                          block_q=128, block_k=128,
                          compute_dtype=jnp.float32))
    assert out2.shape == (seq2, d_out)
    assert jnp.allclose(out2, ref2, atol=1e-3, rtol=1e-3), "tiled path mismatch"

    print("KERNEL_OK")
</pallas_src>

<mosaic_0001>
module attributes {stable_mosaic.version = 11 : i64} {
  func.func @_kv_proj_kernel(%arg0: i32, %arg1: i32, %arg2: memref<128x32xbf16, #tpu.memory_space<vmem>>, %arg3: memref<32x128xbf16, #tpu.memory_space<vmem>>, %arg4: memref<128x128xbf16, #tpu.memory_space<vmem>>) attributes {dimension_semantics = [#tpu.dimension_semantics<parallel>, #tpu.dimension_semantics<parallel>], iteration_bounds = array<i64: 2, 1>, scalar_prefetch = 0 : i64, scratch_operands = 0 : i64, tpu.core_type = #tpu.core_type<tc>, window_params = [{transform_indices = @transform_0, window_bounds = array<i64: 128, 32>}, {transform_indices = @transform_1, window_bounds = array<i64: 32, 128>}, {transform_indices = @transform_2, window_bounds = array<i64: 128, 128>}]} {
    %c0 = arith.constant 0 : index
    %c0_0 = arith.constant 0 : index
    %0 = vector.load %arg2[%c0, %c0_0] : memref<128x32xbf16, #tpu.memory_space<vmem>>, vector<128x32xbf16>
    %c0_1 = arith.constant 0 : index
    %c0_2 = arith.constant 0 : index
    %1 = vector.load %arg3[%c0_1, %c0_2] : memref<32x128xbf16, #tpu.memory_space<vmem>>, vector<32x128xbf16>
    %cst = arith.constant dense<0.000000e+00> : vector<128x128xf32>
    %2 = tpu.matmul %0, %1, %cst {dimension_numbers = #tpu.dot_dimension_numbers<[1], [0], [0], [1], [0, 0, 1, 1], [], []>} : vector<128x32xbf16>, vector<32x128xbf16>, vector<128x128xf32> -> vector<128x128xf32>
    %3 = arith.truncf %2 : vector<128x128xf32> to vector<128x128xbf16>
    %c0_3 = arith.constant 0 : index
    %c0_4 = arith.constant 0 : index
    %4 = vector.load %arg4[%c0_3, %c0_4] : memref<128x128xbf16, #tpu.memory_space<vmem>>, vector<128x128xbf16>
    tpu.vector_store %arg4[%c0_3, %c0_4], %3 {strides = array<i32>} : memref<128x128xbf16, #tpu.memory_space<vmem>>, vector<128x128xbf16>,
    return
  }
  func.func @transform_0(%arg0: i32, %arg1: i32) -> (i32, i32) {
    %c0_i32 = arith.constant 0 : i32
    %c0_i32_0 = arith.constant 0 : i32
    return %arg1, %c0_i32 : i32, i32
  }
  func.func @transform_1(%arg0: i32, %arg1: i32) -> (i32, i32) {
    %c0_i32 = arith.constant 0 : i32
    %c0_i32_0 = arith.constant 0 : i32
    return %c0_i32, %arg0 : i32, i32
  }
  func.func @transform_2(%arg0: i32, %arg1: i32) -> (i32, i32) {
    %c0_i32 = arith.constant 0 : i32
    return %arg1, %arg0 : i32, i32
  }
}

</mosaic_0001>

<bundles_post_ra>
// kernel: tpu_custom_call.1
= control target key start
LH: loop header
LB: loop body
LE: loop exit
PB: predicated region body
PF: predicated region fallthrough
CT: control target
= control target key end

     0   :  { %7 = vsyncpa [#allocation4], 0  ;;  %s1084_s0 = inlined_call_operand.vmem [shape: bf16[128,32], index: 0, kind: input, shape index: {}]   ;;  %s1085_s1 = inlined_call_operand.vmem [shape: bf16[32,256], index: 1, kind: input, shape index: {}]   ;;  %s1086_s2 = inlined_call_operand.hbm [shape: bf16[128,256], index: 2, kind: output, shape index: {}]  }
   0x1   :  { %9 = vsyncpa [#allocation4 + $0x1], 0  ;;  %s928_s9 = smov 0   ;;  %s930_s10 = smov 0  }
   0x2   :  { %s932_s11 = smov 0   ;;  %s934_s12 = smov 0  }
   0x3   :  { %s936_s13 = smov 0   ;;  %s938_s14 = smov 0  }
   0x4 LB: > { %s616_s15 = sadd.s32 4294967295, %s907_s14   ;;  %s617_s16 = sadd.s32 4294967294, %s907_s14   ;;  %s907_s14 = sphi %s938_s14, %s15_s14   ;;  %s903_s13 = sphi %s936_s13, %s1093_s13   ;;  %s899_s12 = sphi %s934_s12, %s1092_s12   ;;  %s895_s11 = sphi %s932_s11, %s1091_s11   ;;  %s891_s10 = sphi %s930_s10, %s1090_s10   ;;  %s887_s9 = sphi %s928_s9, %s1089_s9  }
   0x5   : > { %s27_s17 = sadd.s32 1, %s903_s13  ;;  %s60_s18 = sadd.s32 1, %s895_s11 }
   0x6   : > { %p29_p0 = scmp.ge.s32.totalorder %s27_s17, 2  ;;  %p67_p1 = scmp.ne.s32.totalorder %s895_s11, %s891_s10 }
   0x7   : > { %p68_p2 = scmp.eq.s32.totalorder %s907_s14, 0  ;;  %p99_p3 = scmp.eq.s32.totalorder %s616_s15, 1 }
   0x8   : > { %s1095_s17 = smov (%p29_p0, %s27_s17), 0  ;;  %p104_p6 = scmp.ne.s32.totalorder %s891_s10, %s887_s9 }
   0x9   : > { %p69_p4 = por %p68_p2, %p67_p1  ;;  %p967_p5 = por %p99_p3, %p67_p1 }
   0xa   : > { %s57_s20 = ssub.s32 %s903_s13, %s1095_s17  ;;  %p105_p8 = scmp.eq.s32.totalorder %s617_s16, 1 }
   0xb   : > { %p58_p7 = scmp.eq.s32.totalorder %s57_s20, 0  ;;  %p620_p10 = scmp.ge.s32.totalorder %s907_s14, 2 }
   0xc   : > { %p978_p9 = por %p105_p8, %p104_p6 }
   0xd   : > { %s976_s21 = scalar_select %p58_p7, %s895_s11, %s60_s18  }
   0xe   : > { %130 = sbr.rel (%p620_p10) target bundleno = 28 (0x1c), region = 20 }
  0x15   : > { %133 = sbr.rel (!%p69_p4) target bundleno = 28 (0x1c), region = 24  ;;  %s135_s23 = sand.u32 (%p69_p4), 1, %s895_s11  }
  0x16   : > { %s622_s24 = sshll.u32 (%p69_p4), %s903_s13, 2  ;;  %s621_s25 = sshll.u32 (%p69_p4), %s135_s23, 4 }
  0x17   : > { %s139_s28 = scalar_lea.vmem (%p69_p4), %s1085_s1, %s622_s24  ;;  %s137_s29 = scalar_lea.vmem (%p69_p4), [#allocation2], %s621_s25 }
  0x18   : > { %v155_v0 = vld [vmem:[%s139_s28] sm:$0xf] (%p69_p4)  ;;  %v157_v1 = vld [vmem:[%s139_s28 + $0x8] sm:$0xf] (%p69_p4)  ;;  %v159_v2 = vld [vmem:[%s139_s28 + $0x10] sm:$0xf] (%p69_p4) }
  0x19   : > { %156 = vst [vmem:[%s137_s29] sm:$0xf] (%p69_p4), %v155_v0  ;;  %158 = vst [vmem:[%s137_s29 + $0x4] sm:$0xf] (%p69_p4), %v157_v1  ;;  %v161_v3 = vld [vmem:[%s139_s28 + $0x18] sm:$0xf] (%p69_p4) }
  0x1a   : > { %160 = vst [vmem:[%s137_s29 + $0x8] sm:$0xf] (%p69_p4), %v159_v2  ;;  %162 = vst [vmem:[%s137_s29 + $0xc] sm:$0xf] (%p69_p4), %v161_v3 }
  0x1c PF: > { %p623_p11 = scmp.ge.s32.totalorder %s907_s14, 1  ;;  %p192_p12 = scmp.lt.s32.totalorder %s907_s14, 3 }
  0x1e   : > { %p193_p13 = pnand %p623_p11, %p192_p12 }
  0x1f   : > { %s993_s30 = sand.u32 (!%p193_p13), 1, %s891_s10   ;;  %v821_v4 = vld [vmem:[%s1084_s0] sm:$0xff] (!%p193_p13)   ;;  %vm305_vm0 = vcmask (!%p193_p13), 261120   ;;  %v823_v8 = vld [vmem:[%s1084_s0 + $0x8] sm:$0xff] (!%p193_p13)   ;;  %v825_v10 = vld [vmem:[%s1084_s0 + $0x10] sm:$0xff] (!%p193_p13)   ;;  %s661_s7 = sshll.u32 (!%p193_p13), %s899_s12, 6 }
  0x20   : > { %196 = sbr.rel (%p193_p13) target bundleno = 284 (0x11c), region = 65  ;;  %s624_s5 = sshll.u32 (!%p193_p13), %s993_s30, 4  ;;  %v822_v5 = vld [vmem:[%s1084_s0 + $0x20] sm:$0xff] (!%p193_p13)   ;;  %741 = vmatprep.mubr.msk.bf16.mxu0 (!%p193_p13), %vm305_vm0, %v821_v4  ;;  %v824_v9 = vld [vmem:[%s1084_s0 + $0x28] sm:$0xff] (!%p193_p13)   ;;  %v826_v11 = vld [vmem:[%s1084_s0 + $0x30] sm:$0xff] (!%p193_p13)  }
  0x21   : > { %s201_s8 = scalar_lea.vmem (!%p193_p13), [#allocation2], %s624_s5  ;;  %749 = vmatprep.mubr.msk.bf16.mxu1 (!%p193_p13), %vm305_vm0, %v822_v5  ;;  %v827_v12 = vld [vmem:[%s1084_s0 + $0x18] sm:$0xff] (!%p193_p13)   ;;  %s625_s4 = sshll.u32 (!%p193_p13), %s993_s30, 6 }
  0x22   : > { %v819_v6 = vld [vmem:[%s201_s8] sm:$0xff] (!%p193_p13)   ;;  %v820_v7 = vld [vmem:[%s201_s8 + $0x8] sm:$0xff] (!%p193_p13)   ;;  %s224_s5 = scalar_lea.vmem (!%p193_p13), [#allocation3], %s625_s4  ;;  %s1035_s16 = scalar_lea.hbm (!%p193_p13), %s1086_s2, %s661_s7 }
  0x23   : > { %737 = vmatprep.subr.bf16.mxu0 (!%p193_p13), %v819_v6  ;;  %757 = vmatprep.subr.bf16.mxu1 (!%p193_p13), %v819_v6  ;;  %v828_v13 = vld [vmem:[%s1084_s0 + $0x38] sm:$0xff] (!%p193_p13)   ;;  %s523_s6 = sshll.u32 (!%p193_p13), %s224_s5, 4  ;;  %s508_s12 = scalar_lea.sflag (!%p193_p13), [#allocation4], %s993_s30  ;;  %s1030_s6 = int_to_ptr.vmem [resolvable:$true] %s523_s6 }
  0x24   : > { %738 = vmatpush3.bf16.msra.mxu0 (!%p193_p13), %v819_v6  ;;  %759 = vmatpush3.bf16.msra.mxu1 (!%p193_p13), %v819_v6  ;;  %s829_s18 = scalar_lea.vmem (!%p193_p13), %s1030_s6, 1024  ;;  %s909_s20 = smov (!%p193_p13), [#allocation3]  }
  0x25   : > { %739 = vmatprep.subr.bf16.mxu0 (!%p193_p13), %v820_v7  ;;  %758 = vmatprep.subr.bf16.mxu1 (!%p193_p13), %v820_v7  ;;  %p830_p0 = scmp.ne.s32.totalorder (!%p193_p13), %s1030_s6, %s829_s18  ;;  %s833_s23 = sshll.u32 (!%p193_p13), %s909_s20, 4  ;;  %s834_s23 = int_to_ptr.vmem [resolvable:$false] %s833_s23 }
  0x26   : > { %s835_s24 = scalar_lea.vmem (!%p193_p13), %s834_s23, 2048  ;;  %p836_p3 = scmp.lt.s32.totalorder (!%p193_p13), %s1030_s6, %s834_s23 }
  0x27   : > { %p831_p1 = pnand %p830_p0, %p967_p5  ;;  %p837_p4 = scmp.lt.s32.totalorder %s835_s24, %s829_s18 }
  0x28   : > { %740 = vmatpush3.bf16.msra.mxu0 %v820_v7  ;;  %760 = vmatpush3.bf16.msra.mxu1 %v820_v7 }
  0x29   : > { %p832_p2 = pneg %p831_p1  ;;  %p838_p6 = por %p837_p4, %p836_p3 }
  0x2b   : > { %742 = vmatmul.mubr.msk.bf16.vlgmr.msra.gmra.mrb[0].mxu0 %vm305_vm0, %v823_v8  ;;  %750 = vmatmul.mubr.msk.bf16.vlgmr.msra.gmra.mrb[0].mxu1 %vm305_vm0, %v824_v9  ;;  %p839_p7 = pnand %p838_p6, %p832_p2 }
  0x2c   : > { %745 = vmatprep.mubr.msk.bf16.mxu0 %vm305_vm0, %v825_v10  ;;  %753 = vmatprep.mubr.msk.bf16.mxu1 %vm305_vm0, %v826_v11 }
  0x33   : > { %746 = vmatmul.mubr.msk.bf16.gmra.mrb[4].mxu0 %vm305_vm0, %v827_v12  ;;  %754 = vmatmul.mubr.msk.bf16.gmra.mrb[4].mxu1 %vm305_vm0, %v828_v13 }
  0xfe   : > { %v743_v14 = vpop.f32.mrb[0].mxu0  ;;  %v751_v15 = vpop.f32.mrb[0].mxu1 }
  0xff   : > { %v364_v16 = vpop.f32.mrb[1].mxu0  ;;  %v396_v17 = vpop.f32.mrb[1].mxu1 }
 0x100   : > { %v744_v18 = vpop.f32.mrb[2].mxu0  ;;  %v752_v19 = vpop.f32.mrb[2].mxu1 }
 0x101   : > { %v688_v20 = vpack.c.bf16 %v744_v18, %v743_v14  ;;  %v708_v21 = vpack.c.bf16 %v752_v19, %v751_v15  ;;  %v367_v22 = vpop.f32.mrb[3].mxu0  ;;  %v399_v23 = vpop.f32.mrb[3].mxu1 }
 0x102   : > { %v683_v24 = vpack.c.bf16 %v367_v22, %v364_v16  ;;  %v703_v25 = vpack.c.bf16 %v399_v23, %v396_v17 }
 0x103   : > { %720 = vst [vmem:[%s224_s5 + $0x8] sm:$0xff] %v688_v20   ;;  %724 = vst [vmem:[%s224_s5 + $0x28] sm:$0xff] %v708_v21  }
 0x104   : > { %684 = vst [vmem:[%s224_s5] sm:$0xff] %v683_v24   ;;  %723 = vst [vmem:[%s224_s5 + $0x20] sm:$0xff] %v703_v25  }
 0x106   : > { %v747_v26 = vpop.f32.mrb[4].mxu0  ;;  %v755_v27 = vpop.f32.mrb[4].mxu1 }
 0x107   : > { %v380_v28 = vpop.f32.mrb[5].mxu0  ;;  %v412_v29 = vpop.f32.mrb[5].mxu1 }
 0x108   : > { %v748_v30 = vpop.f32.mrb[6].mxu0  ;;  %v756_v31 = vpop.f32.mrb[6].mxu1 }
 0x109   : > { %v698_v32 = vpack.c.bf16 %v748_v30, %v747_v26  ;;  %v718_v33 = vpack.c.bf16 %v756_v31, %v755_v27  ;;  %v383_v34 = vpop.f32.mrb[7].mxu0  ;;  %v415_v35 = vpop.f32.mrb[7].mxu1 }
 0x10a   : > { %v693_v36 = vpack.c.bf16 %v383_v34, %v380_v28  ;;  %v713_v37 = vpack.c.bf16 %v415_v35, %v412_v29 }
 0x10b   : > { %722 = vst [vmem:[%s224_s5 + $0x18] sm:$0xff] %v698_v32   ;;  %726 = vst [vmem:[%s224_s5 + $0x38] sm:$0xff] %v718_v33  }
 0x10c   : > { %721 = vst [vmem:[%s224_s5 + $0x10] sm:$0xff] %v693_v36   ;;  %725 = vst [vmem:[%s224_s5 + $0x30] sm:$0xff] %v713_v37  }
 0x10d   : > { %842 = shalt.err (!%p839_p7)
}
 0x10e   : > { %s843_s25 = scalar_lea.hbm %s1035_s16, 1024  ;;  %s847_s28 = scalar_lea.hbm %s1086_s2, 2048 }
 0x10f   : > { %p844_p8 = scmp.ne.s32.totalorder %s1035_s16, %s843_s25  ;;  %p848_p13 = scmp.lt.u32.totalorder %s1035_s16, %s1086_s2 }
 0x110   : > { %p849_p0 = scmp.lt.u32.totalorder %s847_s28, %s843_s25  ;;  %p851_p2 = scmp.lt.u32.totalorder %s843_s25, %s1035_s16 }
 0x111   : > { %p845_p11 = pnand %p844_p8, %p967_p5 }
 0x112   : > { %p850_p1 = por %p849_p0, %p848_p13 }
 0x113   : > { %p846_p12 = pneg %p845_p11 }
 0x114   : > { %p852_p3 = por %p851_p2, %p850_p1 }
 0x116   : > { %p853_p4 = pnand %p852_p3, %p846_p12 }
 0x118   : > { %856 = shalt.err (!%p853_p4)
}
 0x119   : > { %s910_s4 = smov 64   ;;  %s911_s5 = smov 128  }
 0x11a   : > { %s912_s7 = smov 4  }
 0x11b   : > { %761 = dma.vmem_to_hbm [thread:$0]  (%p967_p5), %s1030_s6, 1024, %s1035_s16, %s508_s12, %s910_s4, %s911_s5, %s912_s7  }
 0x11c PF: > { %s538_s8 = sand.u32 1, %s887_s9   ;;  %p764_p6 = pnand %p620_p10, %p978_p9 }
 0x11d   : > { %s539_s15 = scalar_lea.sflag [#allocation4], %s538_s8 }
 0x11e   : > { %882 = dma.done.wait (!%p764_p6), %s539_s15, 1024  }
 0x11f   : > { %884 = vsyncadd (!%p764_p6), %s539_s15, 4294966272  ;;  %s15_s14 = sadd.s32 1, %s907_s14   ;;  %s1089_s9 = smov %s891_s10 }
 0x120   : > { %p12_p7 = scmp.ge.s32.totalorder %s15_s14, 4   ;;  %s1090_s10 = smov %s895_s11 }
 0x121   : > { %s1091_s11 = smov %s976_s21  ;;  %s1092_s12 = smov %s903_s13 }
 0x122   : > { %s1093_s13 = smov %s1095_s17  ;;  %14 = sbr.rel (!%p12_p7) target bundleno = 4 (0x4), region = 112 }
 0x129   :  { %544 = vsyncpa [#allocation4], 1 }
 0x12a   :  { %546 = vsyncpa [#allocation4 + $0x1], 1 }

</bundles_post_ra>
